<compile_context>
chip_gen: v7x
topology: tpu7x:2x2x1
jax: 0.10.0
libtpu: 0.0.40
codegen_flags: <defaults>
</compile_context>

<pallas_src>
import jax
import jax.numpy as jnp
from jax.experimental import pallas as pl
from jax.experimental.pallas import tpu as pltpu

EPS = 1e-5
KH = KW = 3
STRIDE = 2
C_OUT = 32
H = W = 10
OH = (H - KH) // STRIDE + 1   # 4
OW = (W - KW) // STRIDE + 1   # 4
K = KH * KW                   # 9
K_PAD = 16                    # contraction dim padded to a sublane-friendly 16


def bn_conv_kernel(scal_ref, x_ref, patches_ref, wpack_ref, o_ref):
    # scal_ref:    SMEM (2,)            [gamma, beta]
    # x_ref:       VMEM (H, W)           raw input plane (for BN batch statistics)
    # patches_ref: VMEM (OH*OW, K_PAD)   raw im2col patches, zero-padded along K
    # wpack_ref:   VMEM (K_PAD + 2, C_OUT):
    #                rows [0:K_PAD]   = conv weight (K, Cout), zero-padded rows
    #                row  K_PAD       = conv bias
    #                row  K_PAD + 1   = per-channel weight sum  sum_k w[k, c]
    # o_ref:       VMEM (OH*OW, C_OUT)
    x = x_ref[...]

    # --- BatchNorm batch statistics (training mode), single pass ---
    n = float(H * W)
    mean = jnp.sum(x) / n
    ex2 = jnp.sum(x * x) / n
    var = ex2 - mean * mean                       # biased variance (PyTorch BN)
    inv_std = jax.lax.rsqrt(var + EPS)

    gamma = scal_ref[0]
    beta = scal_ref[1]
    s = gamma * inv_std                           # scale folded through the conv
    t = beta - mean * s                           # shift folded through the conv

    w = wpack_ref[0:K_PAD, :]                     # (K_PAD, C_OUT), tile-aligned
    bias = wpack_ref[K_PAD:K_PAD + 1, :]          # (1, C_OUT)
    wsum = wpack_ref[K_PAD + 1:K_PAD + 2, :]      # (1, C_OUT)

    # conv(s*x + t) == s * conv(x) + t * sum_k(w) + bias   (raw-x matmul on MXU)
    raw = jnp.dot(patches_ref[...], w, preferred_element_type=jnp.float32)  # (16, 32)
    o_ref[...] = s * raw + (t * wsum + bias)


def _im2col(x2d):
    # 3x3 stride-2 patches of the raw (H, W) plane -> (OH*OW, K); done by XLA.
    cols = []
    for kh in range(KH):
        for kw in range(KW):
            patch = jax.lax.slice(
                x2d,
                (kh, kw),
                (kh + (OH - 1) * STRIDE + 1, kw + (OW - 1) * STRIDE + 1),
                (STRIDE, STRIDE),
            )                                     # (OH, OW)
            cols.append(patch.reshape(OH * OW))
    return jnp.stack(cols, axis=1)                # (OH*OW, K) = (16, 9)


@jax.jit
def model_forward(x, conv_w, conv_b, bn_gamma, bn_beta):
    # x: (1, 1, H, W) NCHW float32
    x2d = x[0, 0]                                                # (H, W)

    patches = _im2col(x2d)                                       # (16, 9)  raw x
    patches = jnp.pad(patches, ((0, 0), (0, K_PAD - K)))         # (16, 16)

    w_km = conv_w.reshape(C_OUT, K).T                            # (9, 32)  pre-transposed
    w_pad = jnp.zeros((K_PAD, C_OUT), jnp.float32).at[:K, :].set(w_km)
    bias = conv_b.reshape(1, C_OUT)                              # (1, 32)
    wsum = jnp.sum(w_km, axis=0, keepdims=True)                  # (1, 32)
    wpack = jnp.concatenate([w_pad, bias, wsum], axis=0)         # (18, 32)

    scal = jnp.stack([bn_gamma[0], bn_beta[0]]).astype(jnp.float32)  # (2,)

    vmem = pl.BlockSpec(memory_space=pltpu.MemorySpace.VMEM)
    smem = pl.BlockSpec(memory_space=pltpu.MemorySpace.SMEM)
    out = pl.pallas_call(
        bn_conv_kernel,
        out_shape=jax.ShapeDtypeStruct((OH * OW, C_OUT), jnp.float32),
        in_specs=[smem, vmem, vmem, vmem],
        out_specs=vmem,
    )(scal, x2d, patches, wpack)                                 # (16, 32)

    # (spatial, channel) -> NCHW (1, 32, 4, 4); fused by XLA inside this jit.
    return out.T.reshape(1, C_OUT, OH, OW)


def reference_forward(x, conv_w, conv_b, bn_gamma, bn_beta):
    # Pure-JAX reference (two-pass variance, un-folded BN) for sanity checking.
    mean = jnp.mean(x)
    var = jnp.mean((x - mean) ** 2)
    xn = (x - mean) / jnp.sqrt(var + EPS) * bn_gamma[0] + bn_beta[0]
    return jax.lax.conv_general_dilated(
        xn, conv_w, window_strides=(STRIDE, STRIDE), padding="VALID",
        dimension_numbers=("NCHW", "OIHW", "NCHW"),
    ) + conv_b.reshape(1, C_OUT, 1, 1)


if __name__ == "__main__":
    key = jax.random.PRNGKey(0)
    kx, kw, kb = jax.random.split(key, 3)

    x = jax.random.normal(kx, (1, 1, H, W), dtype=jnp.float32)

    # Deterministic parameter init (Conv2d(1, 32, 3) shapes; BN affine for 1 channel).
    fan_in = 1 * KH * KW
    bound = 1.0 / (fan_in ** 0.5)
    conv_w = jax.random.uniform(kw, (C_OUT, 1, KH, KW), jnp.float32, -bound, bound)
    conv_b = jax.random.uniform(kb, (C_OUT,), jnp.float32, -bound, bound)
    bn_gamma = jnp.ones((1,), jnp.float32)
    bn_beta = jnp.zeros((1,), jnp.float32)

    out = model_forward(x, conv_w, conv_b, bn_gamma, bn_beta)
    out = jax.block_until_ready(out)

    ref = reference_forward(x, conv_w, conv_b, bn_gamma, bn_beta)
    assert out.shape == (1, C_OUT, OH, OW), out.shape
    assert jnp.allclose(out, ref, atol=1e-4, rtol=1e-4), float(jnp.max(jnp.abs(out - ref)))

    print("KERNEL_OK")
</pallas_src>

<mosaic_0001>
module attributes {stable_mosaic.version = 11 : i64} {
  func.func @bn_conv_kernel(%arg0: memref<2xf32, #tpu.memory_space<smem>>, %arg1: memref<10x10xf32, #tpu.memory_space<vmem>>, %arg2: memref<16x16xf32, #tpu.memory_space<vmem>>, %arg3: memref<18x32xf32, #tpu.memory_space<vmem>>, %arg4: memref<16x32xf32, #tpu.memory_space<vmem>>) attributes {dimension_semantics = [], scalar_prefetch = 0 : i64, scratch_operands = 0 : i64, tpu.core_type = #tpu.core_type<tc>} {
    %c0 = arith.constant 0 : index
    %c0_0 = arith.constant 0 : index
    %0 = vector.load %arg1[%c0, %c0_0] : memref<10x10xf32, #tpu.memory_space<vmem>>, vector<10x10xf32>
    %1 = vector.shape_cast %0 : vector<10x10xf32> to vector<1x10x10xf32>
    %cst = arith.constant dense<0.000000e+00> : vector<1xf32>
    %2 = vector.multi_reduction <add>, %1, %cst [1, 2] : vector<1x10x10xf32> to vector<1xf32>
    %3 = vector.shape_cast %2 : vector<1xf32> to vector<1x1x1xf32>
    %4 = vector.extract %3[0, 0, 0] : f32 from vector<1x1x1xf32>
    %cst_1 = arith.constant 1.000000e+02 : f32
    %5 = arith.divf %4, %cst_1 : f32
    %6 = arith.mulf %0, %0 : vector<10x10xf32>
    %7 = vector.shape_cast %6 : vector<10x10xf32> to vector<1x10x10xf32>
    %cst_2 = arith.constant dense<0.000000e+00> : vector<1xf32>
    %8 = vector.multi_reduction <add>, %7, %cst_2 [1, 2] : vector<1x10x10xf32> to vector<1xf32>
    %9 = vector.shape_cast %8 : vector<1xf32> to vector<1x1x1xf32>
    %10 = vector.extract %9[0, 0, 0] : f32 from vector<1x1x1xf32>
    %cst_3 = arith.constant 1.000000e+02 : f32
    %11 = arith.divf %10, %cst_3 : f32
    %12 = arith.mulf %5, %5 : f32
    %13 = arith.subf %11, %12 : f32
    %cst_4 = arith.constant 9.99999974E-6 : f32
    %14 = arith.addf %13, %cst_4 : f32
    %15 = math.rsqrt %14 : f32
    %c0_5 = arith.constant 0 : index
    %16 = memref.load %arg0[%c0_5] : memref<2xf32, #tpu.memory_space<smem>>
    %c1 = arith.constant 1 : index
    %17 = memref.load %arg0[%c1] : memref<2xf32, #tpu.memory_space<smem>>
    %18 = arith.mulf %16, %15 : f32
    %19 = arith.mulf %5, %18 : f32
    %20 = arith.subf %17, %19 : f32
    %c0_6 = arith.constant 0 : index
    %c0_7 = arith.constant 0 : index
    %21 = vector.load %arg3[%c0_6, %c0_7] : memref<18x32xf32, #tpu.memory_space<vmem>>, vector<16x32xf32>
    %c16 = arith.constant 16 : index
    %c0_8 = arith.constant 0 : index
    %22 = vector.load %arg3[%c16, %c0_8] : memref<18x32xf32, #tpu.memory_space<vmem>>, vector<1x32xf32>
    %c17 = arith.constant 17 : index
    %c0_9 = arith.constant 0 : index
    %23 = vector.load %arg3[%c17, %c0_9] : memref<18x32xf32, #tpu.memory_space<vmem>>, vector<1x32xf32>
    %c0_10 = arith.constant 0 : index
    %c0_11 = arith.constant 0 : index
    %24 = vector.load %arg2[%c0_10, %c0_11] : memref<16x16xf32, #tpu.memory_space<vmem>>, vector<16x16xf32>
    %cst_12 = arith.constant dense<0.000000e+00> : vector<16x32xf32>
    %25 = tpu.matmul %24, %21, %cst_12 {dimension_numbers = #tpu.dot_dimension_numbers<[1], [0], [0], [1], [0, 0, 1, 1], [], []>} : vector<16x16xf32>, vector<16x32xf32>, vector<16x32xf32> -> vector<16x32xf32>
    %26 = vector.broadcast %18 : f32 to vector<16x32xf32>
    %27 = arith.mulf %26, %25 : vector<16x32xf32>
    %28 = vector.broadcast %20 : f32 to vector<1x32xf32>
    %29 = arith.mulf %28, %23 : vector<1x32xf32>
    %30 = arith.addf %29, %22 : vector<1x32xf32>
    %31 = vector.broadcast %30 : vector<1x32xf32> to vector<16x32xf32>
    %32 = arith.addf %27, %31 : vector<16x32xf32>
    %c0_13 = arith.constant 0 : index
    %c0_14 = arith.constant 0 : index
    %33 = vector.load %arg4[%c0_13, %c0_14] : memref<16x32xf32, #tpu.memory_space<vmem>>, vector<16x32xf32>
    tpu.vector_store %arg4[%c0_13, %c0_14], %32 {strides = array<i32>} : memref<16x32xf32, #tpu.memory_space<vmem>>, vector<16x32xf32>,
    return
  }
}

</mosaic_0001>

<bundles_post_ra>
// kernel: model_forward.1
= control target key start
LH: loop header
LB: loop body
LE: loop exit
PB: predicated region body
PF: predicated region fallthrough
CT: control target
= control target key end

     0   :  { %9 = vsyncpa [#allocation4], 0  ;;  %s334_s0 = inlined_call_operand.vmem [shape: f32[2], index: 0, kind: input, shape index: {}]   ;;  %s335_s1 = inlined_call_operand.vmem [shape: f32[10,10], index: 1, kind: input, shape index: {}]   ;;  %s336_s2 = inlined_call_operand.vmem [shape: f32[16,16], index: 2, kind: input, shape index: {}]   ;;  %s337_s3 = inlined_call_operand.vmem [shape: f32[18,32], index: 3, kind: input, shape index: {}]   ;;  %s338_s4 = inlined_call_operand.hbm [shape: f32[16,32], index: 4, kind: output, shape index: {}]  }
   0x1   :  { %10 = vsyncpa [#allocation3], 0  ;;  %s17_s17 = sshll.u32 %s334_s0, 4  ;;  %s18_s17 = int_to_ptr.vmem [resolvable:$true] %s17_s17 }
   0x2   :  { %s228_s18 = scalar_lea.vmem %s18_s17, 16  ;;  %p233_p1 = scmp.lt.s32.totalorder %s18_s17, %s18_s17 }
   0x3   :  { %p229_p0 = scmp.ne.s32.totalorder %s18_s17, %s228_s18  ;;  %p234_p2 = scmp.lt.s32.totalorder %s228_s18, %s228_s18 }
   0x5   :  { %p235_p3 = por %p234_p2, %p233_p1 }
   0x7   :  { %p236_p4 = pnand %p235_p3, %p229_p0 }
   0x9   :  { %239 = shalt.err (!%p236_p4)
}
   0xa   :  { %s266_s19 = smov [#allocation2]  }
   0xb   :  { %20 = dma.vmem_to_smem %s18_s17, 16, %s266_s19, [#allocation4]  }
   0xc   :  { %262 = dma.done.wait [#allocation4], 16  }
   0xd   :  { %263 = vsyncadd [#allocation4], 4294967280 }
   0xe   :  { %30 = sfence }
   0xf   :  { %v31_v0 = vld [vmem:[%s335_s1] sm:$0xff]  ;;  %v32_v1 = vld [vmem:[%s335_s1 + $0x8] sm:$0x3]  ;;  %vm33_vm0 = vcmask 80896   ;;  %vm35_vm1 = vcmask 74752   ;;  %vm84_vm2 = vcmask 130048   ;;  %v172_v33 = vlaneseq }
  0x10   :  { %v78_v2 = vld [vmem:[%s337_s3] sm:$0xff]  ;;  %v34_v3 = vsel %vm33_vm0, %v31_v0, 0.0  ;;  %v36_v4 = vsel %vm35_vm1, %v32_v1, 0.0  ;;  %v50_v5 = vmul.f32 %v31_v0, %v31_v0  ;;  %v51_v6 = vmul.f32 %v32_v1, %v32_v1  ;;  %v79_v7 = vld [vmem:[%s337_s3 + $0x8] sm:$0xff]  ;;  %s73_s10 = sld [smem:[#allocation2]]  ;;  %s198_s11 = sld [smem:[#allocation2 + $0x1]] }
  0x11   :  { %v82_v8 = vld [vmem:[%s336_s2] sm:$0xff]  ;;  %v37_v9 = vadd.f32 %v36_v4, %v34_v3  ;;  %v212_v10 = vpack.c.bf16 %v79_v7, %v78_v2  ;;  %v83_v14 = vld [vmem:[%s336_s2 + $0x8] sm:$0xff]  ;;  %v173_v34 = vshrl.u32 %v172_v33, 7  ;;  %v81_v35 = vld [vmem:[%s337_s3 + $0x11] sm:$0x1]  ;;  %s267_s20 = smov [#allocation5]  }
  0x12   :  { %v52_v11 = vsel %vm33_vm0, %v50_v5, 0.0  ;;  %v53_v12 = vsel %vm35_vm1, %v51_v6, 0.0  ;;  %209 = vmatprep.mubr.msk.f32.mxu0 %vm84_vm2, %v82_v8  ;;  %v80_v37 = vld [vmem:[%s337_s3 + $0x10] sm:$0x1]  ;;  %s186_s21 = sshll.u32 %s267_s20, 4  ;;  %vm178_vm3 = vcmask 261120   ;;  %s187_s21 = int_to_ptr.vmem [resolvable:$true] %s186_s21 }
  0x13   :  { %38 = vadd.xlane.f32.xlu0 %v37_v9  ;;  %v54_v13 = vadd.f32 %v53_v12, %v52_v11  ;;  %213 = vmatprep.subr.bf16.mxu0 %v212_v10  ;;  %v174_v39 = vsub.s32 0, %v173_v34  ;;  %s240_s22 = scalar_lea.vmem %s187_s21, 256  ;;  %p245_p6 = scmp.lt.s32.totalorder %s187_s21, %s187_s21 }
  0x14   :  { %215 = vmatpush3.bf16.msra.mxu0 %v212_v10  ;;  %p241_p5 = scmp.ne.s32.totalorder %s187_s21, %s240_s22  ;;  %p246_p7 = scmp.lt.s32.totalorder %s240_s22, %s240_s22 }
  0x16   :  { %p247_p8 = por %p246_p7, %p245_p6 }
  0x17   :  { %55 = vadd.xlane.f32.xlu0 %v54_v13  ;;  %210 = vmatmul.mubr.msk.f32.vlgmr.msra.gmra.mrb[0].mxu0 %vm84_vm2, %v83_v14 }
  0x18   :  { %p248_p9 = pnand %p247_p8, %p241_p5 }
  0xa0   :  { %v39_v15 = vpop.xlane.xlu0 %38 }
  0xa1   :  { %v40_v16 = vrot.slane %v39_v15, 4 }
  0xa3   :  { %v41_v17 = vadd.f32 %v40_v16, %v39_v15 }
  0xa4   :  { %v56_v18 = vpop.xlane.xlu0 %55 }
  0xa5   :  { %v42_v19 = vrot.slane %v41_v17, 2  ;;  %v57_v20 = vrot.slane %v56_v18, 4 }
  0xa7   :  { %v58_v21 = vadd.f32 %v57_v20, %v56_v18  ;;  %v43_v22 = vadd.f32 %v42_v19, %v41_v17 }
  0xa9   :  { %v59_v23 = vrot.slane %v58_v21, 2  ;;  %v44_v24 = vrot.slane %v43_v22, 1 }
  0xab   :  { %v60_v25 = vadd.f32 %v59_v23, %v58_v21  ;;  %v45_v26 = vadd.f32 %v44_v24, %v43_v22 }
  0xad   :  { %216 = vpush %v45_v26  ;;  %v61_v27 = vrot.slane %v60_v25, 1 }
  0xaf   :  { %v62_v28 = vadd.f32 %v61_v27, %v60_v25 }
  0xb1   :  { %218 = vpush %v62_v28 }
  0xde   :  { %s217_s30 = spop %216 }
  0xdf   :  { %s49_s2 = smul.f32 0.01, %s217_s30 }
  0xe1   :  { %s67_s5 = smul.f32 %s49_s2, %s49_s2 }
  0xe2   :  { %s219_s6 = spop %218 }
  0xe3   :  { %s66_s7 = smul.f32 0.01, %s219_s6 }
  0xe5   :  { %s68_s8 = ssub.f32 %s66_s7, %s67_s5 }
  0xe7   :  { %s69_s9 = sadd.f32 1e-05, %s68_s8 }
  0xe9   :  { %v70_v29 = vstv %s69_s9 }
  0xea   :  { %226 = vrsqrt.f32 %v70_v29  ;;  %v211_v30 = vpop.f32.mrb[0].mxu0 }
  0xeb   :  { %v157_v31 = vpop.f32.mrb[1].mxu0 }
  0xf4   :  { %v227_v32 = vpop.eup %226 }
  0xf5   :  { %220 = vpush %v227_v32 }
 0x126   :  { %s221_s12 = spop %220 }
 0x127   :  { %s75_s13 = smul.f32 %s221_s12, %s73_s10 }
 0x129   :  { %s76_s14 = smul.f32 %s75_s13, %s49_s2  ;;  %v166_v40 = vstv %s75_s13 }
 0x12a   :  { %v168_v42 = vmul.f32 %v211_v30, %v166_v40  ;;  %v167_v44 = vmul.f32 %v166_v40, %v157_v31 }
 0x12b   :  { %s77_s15 = ssub.f32 %s198_s11, %s76_s14 }
 0x12d   :  { %v169_v36 = vstv %s77_s15 }
 0x12e   :  { %v170_v38 = vmul.f32 %v169_v36, %v81_v35 }
 0x130   :  { %v171_v41 = vadd.f32 %v170_v38, %v80_v37 }
 0x132   :  { %v175_v43 = vrot.slane %v171_v41, %v174_v39 }
 0x134   :  { %v177_v45 = vadd.f32 %v175_v43, %v168_v42  ;;  %v176_v46 = vadd.f32 %v175_v43, %v167_v44 }
 0x136   :  { %180 = vst.msk [vmem:[#allocation5 + $0x8] sm:$0xff] %vm178_vm3, %v177_v45  ;;  %179 = vst.msk [vmem:[#allocation5] sm:$0xff] %vm178_vm3, %v176_v46 }
 0x137   :  { %251 = shalt.err (!%p248_p9)
}
 0x138   :  { %s252_s0 = scalar_lea.hbm %s338_s4, 256 }
 0x139   :  { %p253_p10 = scmp.ne.s32.totalorder %s338_s4, %s252_s0  ;;  %p256_p11 = scmp.lt.u32.totalorder %s252_s0, %s338_s4 }
 0x13b   :  { %p258_p12 = pnand %p256_p11, %p253_p10 }
 0x13d   :  { %261 = shalt.err (!%p258_p12)
}
 0x13e   :  { %s268_s28 = smov 128   ;;  %s269_s1 = smov 8  }
 0x13f   :  { %192 = dma.vmem_to_hbm [thread:$0]  %s187_s21, 256, %s338_s4, [#allocation3], %s268_s28, %s268_s28, %s269_s1  }
 0x140   :  { %264 = dma.done.wait [#allocation3], 256  }
 0x141   :  { %265 = vsyncadd [#allocation3], 4294967040 }
 0x142   :  { %196 = vsyncpa [#allocation3], 1 }
 0x143   :  { %197 = vsyncpa [#allocation4], 1 }

</bundles_post_ra>
